<compile_context>
chip_gen: v6e
topology: v6e:2x2x1
jax: 0.10.0
libtpu: 0.0.40
codegen_flags: <defaults>
</compile_context>

<pallas_src>
import jax
import jax.numpy as jnp
from jax.experimental import pallas as pl
from jax.experimental.pallas import tpu as pltpu


def _round_up(x, m):
    return ((x + m - 1) // m) * m


def _reparam_kernel(we_ref, wr_ref, wm_ref, be_ref, br_ref, bm_ref,
                    w_out_ref, b_out_ref):
    """w = eps_w * sigmoid(rho_w) + mu_w ; b = eps_b * sigmoid(rho_b) + mu_b."""
    w = we_ref[...] * jax.nn.sigmoid(wr_ref[...]) + wm_ref[...]
    b = be_ref[...] * jax.nn.sigmoid(br_ref[...]) + bm_ref[...]
    w_out_ref[...] = w.astype(w_out_ref.dtype)   # bf16 stream for the MXU
    b_out_ref[...] = b.astype(b_out_ref.dtype)   # bias stays f32


def sparse_bayesian_conv2d(x, weight_mu, weight_rho, bias_mu, bias_rho,
                           eps_w, eps_b, *, out_tile_n=256):
    """Pallas forward of SparseBayesianConv2d (stride 1, VALID, square kernel)."""
    N, C, H, W = x.shape
    O, Cw, KH, KW = weight_mu.shape
    assert C == Cw and KH == KW, "square kernels / matching channels only"
    K = KH
    assert K <= H and K <= W
    OH, OW = H - K + 1, W - K + 1
    KK = K * K
    HW = H * W

    # Padded sizes (zero padding is numerically inert and sliced off / unused).
    halo = (K - 1) * W + (K - 1)               # largest flattened-row shift
    HWp = _round_up(HW + halo, 16)
    Cp = _round_up(C, 8)
    Np = _round_up(O, 128)
    TN = out_tile_n if Np % out_tile_n == 0 else 128   # lane-dense output tile
    NJ = Np // TN

    f32, bf16 = jnp.float32, jnp.bfloat16

    # ---- 1) reparameterize weights/bias once (tiny elementwise pass) --------
    # OIHW -> rows ordered (kh*K + kw, c), columns o; flattened 2-D for the
    # elementwise kernel so the sigmoid only runs on real (unpadded) elements.
    def to_flat(w):
        return w.transpose(2, 3, 1, 0).reshape(KK * C, O).astype(f32)

    we, wr, wm = to_flat(eps_w), to_flat(weight_rho), to_flat(weight_mu)
    be = eps_b.reshape(1, O).astype(f32)
    br = bias_rho.reshape(1, O).astype(f32)
    bm = bias_mu.reshape(1, O).astype(f32)

    w_spec = pl.BlockSpec((KK * C, O), lambda i: (0, 0))
    b_spec = pl.BlockSpec((1, O), lambda i: (0, 0))
    w_bf, b_f = pl.pallas_call(
        _reparam_kernel,
        out_shape=(jax.ShapeDtypeStruct((KK * C, O), bf16),
                   jax.ShapeDtypeStruct((1, O), f32)),
        grid=(1,),
        in_specs=[w_spec, w_spec, w_spec, b_spec, b_spec, b_spec],
        out_specs=(w_spec, b_spec),
    )(we, wr, wm, be, br, bm)

    # Pad AFTER the reparam: padded channels/outputs are exact zeros.
    w_bf = jnp.pad(w_bf.reshape(KK, C, O), ((0, 0), (0, Cp - C), (0, Np - O)))
    b_f = jnp.pad(b_f, ((0, 0), (0, Np - O)))

    # ---- 2) input layout: NCHW -> flattened NHWC rows (N, HWp, Cp), bf16 ----
    x_rows = jnp.transpose(x, (0, 2, 3, 1)).reshape(N, HW, C)
    x_rows = jnp.pad(x_rows, ((0, 0), (0, HWp - HW), (0, Cp - C))).astype(bf16)

    # ---- 3) main kernel: conv as a sum of K*K shifted matmuls ---------------
    def conv_kernel(x_ref, w_ref, b_ref, o_ref):
        # x_ref: (HWp, Cp) bf16 image rows (resident across the j grid axis)
        # w_ref: (KK, Cp, TN) bf16 reparameterized weights
        # b_ref: (1, TN)  f32 bias
        # o_ref: (HW, TN) f32 output rows (flattened with full-W stride)
        acc = jnp.zeros((HW, TN), jnp.float32)
        for kk in range(KK):                     # static unroll over taps
            off = (kk // K) * W + (kk % K)       # static flattened-row shift
            xs = x_ref[pl.ds(off, HW), :]        # shifted (HW, Cp) window
            acc = acc + jnp.dot(xs, w_ref[kk],
                                preferred_element_type=jnp.float32)
        o_ref[...] = acc + b_ref[...]

    out_rows = pl.pallas_call(
        conv_kernel,
        out_shape=jax.ShapeDtypeStruct((N, HW, Np), f32),
        grid=(N, NJ),
        in_specs=[
            pl.BlockSpec((None, HWp, Cp), lambda n, j: (n, 0, 0)),
            pl.BlockSpec((KK, Cp, TN), lambda n, j: (0, 0, j)),
            pl.BlockSpec((1, TN), lambda n, j: (0, j)),
        ],
        out_specs=pl.BlockSpec((None, HW, TN), lambda n, j: (n, 0, j)),
        compiler_params=pltpu.CompilerParams(
            dimension_semantics=("parallel", "parallel"),
            # Per-step VMEM footprint here is tiny; the raised limit only
            # matters for large C / H*W configs (still <= v7x's 64 MiB).
            vmem_limit_bytes=64 * 1024 * 1024),
    )(x_rows, w_bf, b_f)

    # TODO(synk): for images whose (H*W, C) plane exceeds VMEM, add a spatial
    # grid axis with halo rows fetched via manual pltpu.make_async_copy.

    # ---- 4) back to NCHW: keep valid output channels / positions ------------
    out = out_rows[:, :, :O].reshape(N, H, W, O)[:, :OH, :OW, :]
    return jnp.transpose(out, (0, 3, 1, 2))


if __name__ == "__main__":
    key = jax.random.PRNGKey(0)
    k_x, k_wm, k_wr, k_bm, k_br, k_ew, k_eb = jax.random.split(key, 7)

    # Small shapes consistent with the module: NCHW input, OIHW weights.
    N, C, H, W = 2, 4, 16, 16
    O, K = 8, 3

    x = jax.random.normal(k_x, (N, C, H, W), dtype=jnp.float32)

    # Module __init__ uses zeros; use small deterministic values so the
    # sigmoid / mu path is exercised nontrivially.
    weight_mu = 0.1 * jax.random.normal(k_wm, (O, C, K, K), dtype=jnp.float32)
    weight_rho = 0.1 * jax.random.normal(k_wr, (O, C, K, K), dtype=jnp.float32)
    bias_mu = 0.1 * jax.random.normal(k_bm, (O,), dtype=jnp.float32)
    bias_rho = 0.1 * jax.random.normal(k_br, (O,), dtype=jnp.float32)

    # The Normal(0, 1) prior samples (drawn once, deterministically).
    eps_w = jax.random.normal(k_ew, (O, C, K, K), dtype=jnp.float32)
    eps_b = jax.random.normal(k_eb, (O,), dtype=jnp.float32)

    out = sparse_bayesian_conv2d(x, weight_mu, weight_rho, bias_mu, bias_rho,
                                 eps_w, eps_b)
    out = jax.block_until_ready(out)

    # Pure-JAX f32 reference with the same sampled eps.
    w_ref = eps_w * jax.nn.sigmoid(weight_rho) + weight_mu
    b_ref = eps_b * jax.nn.sigmoid(bias_rho) + bias_mu
    ref = jax.lax.conv_general_dilated(
        x, w_ref, window_strides=(1, 1), padding="VALID",
        dimension_numbers=("NCHW", "OIHW", "NCHW"))
    ref = ref + b_ref[None, :, None, None]

    assert out.shape == (N, O, H - K + 1, W - K + 1), out.shape
    # The kernel computes in bf16 with f32 accumulation (per perf guidance),
    # so tolerances vs. the f32 reference are bf16-appropriate; the relative
    # RMS check keeps the comparison tight in aggregate.
    assert jnp.allclose(out, ref, atol=1e-1, rtol=1e-1), \
        float(jnp.max(jnp.abs(out - ref)))
    rel_rms = jnp.sqrt(jnp.mean((out - ref) ** 2) / (jnp.mean(ref ** 2) + 1e-12))
    assert float(rel_rms) < 2e-2, float(rel_rms)

    print("KERNEL_OK")
</pallas_src>

<mosaic_0001>
module attributes {stable_mosaic.version = 11 : i64} {
  func.func @_reparam_kernel(%arg0: i32, %arg1: memref<36x8xf32, #tpu.memory_space<vmem>>, %arg2: memref<36x8xf32, #tpu.memory_space<vmem>>, %arg3: memref<36x8xf32, #tpu.memory_space<vmem>>, %arg4: memref<1x8xf32, #tpu.memory_space<vmem>>, %arg5: memref<1x8xf32, #tpu.memory_space<vmem>>, %arg6: memref<1x8xf32, #tpu.memory_space<vmem>>, %arg7: memref<36x8xbf16, #tpu.memory_space<vmem>>, %arg8: memref<1x8xf32, #tpu.memory_space<vmem>>) attributes {dimension_semantics = [#tpu.dimension_semantics<arbitrary>], iteration_bounds = array<i64: 1>, scalar_prefetch = 0 : i64, scratch_operands = 0 : i64, tpu.core_type = #tpu.core_type<tc>, window_params = [{pipeline_mode = #tpu.pipeline_mode<synchronous>, transform_indices = @transform_0, window_bounds = array<i64: 36, 8>}, {pipeline_mode = #tpu.pipeline_mode<synchronous>, transform_indices = @transform_1, window_bounds = array<i64: 36, 8>}, {pipeline_mode = #tpu.pipeline_mode<synchronous>, transform_indices = @transform_2, window_bounds = array<i64: 36, 8>}, {pipeline_mode = #tpu.pipeline_mode<synchronous>, transform_indices = @transform_3, window_bounds = array<i64: 1, 8>}, {pipeline_mode = #tpu.pipeline_mode<synchronous>, transform_indices = @transform_4, window_bounds = array<i64: 1, 8>}, {pipeline_mode = #tpu.pipeline_mode<synchronous>, transform_indices = @transform_5, window_bounds = array<i64: 1, 8>}, {pipeline_mode = #tpu.pipeline_mode<synchronous>, transform_indices = @transform_6, window_bounds = array<i64: 36, 8>}, {pipeline_mode = #tpu.pipeline_mode<synchronous>, transform_indices = @transform_7, window_bounds = array<i64: 1, 8>}]} {
    %c0 = arith.constant 0 : index
    %c0_0 = arith.constant 0 : index
    %0 = vector.load %arg1[%c0, %c0_0] : memref<36x8xf32, #tpu.memory_space<vmem>>, vector<36x8xf32>
    %c0_1 = arith.constant 0 : index
    %c0_2 = arith.constant 0 : index
    %1 = vector.load %arg2[%c0_1, %c0_2] : memref<36x8xf32, #tpu.memory_space<vmem>>, vector<36x8xf32>
    %2 = arith.negf %1 : vector<36x8xf32>
    %3 = math.exp %2 : vector<36x8xf32>
    %cst = arith.constant 1.000000e+00 : f32
    %4 = vector.broadcast %cst : f32 to vector<36x8xf32>
    %5 = arith.addf %4, %3 : vector<36x8xf32>
    %6 = arith.divf %4, %5 : vector<36x8xf32>
    %7 = arith.mulf %0, %6 : vector<36x8xf32>
    %c0_3 = arith.constant 0 : index
    %c0_4 = arith.constant 0 : index
    %8 = vector.load %arg3[%c0_3, %c0_4] : memref<36x8xf32, #tpu.memory_space<vmem>>, vector<36x8xf32>
    %9 = arith.addf %7, %8 : vector<36x8xf32>
    %c0_5 = arith.constant 0 : index
    %c0_6 = arith.constant 0 : index
    %10 = vector.load %arg4[%c0_5, %c0_6] : memref<1x8xf32, #tpu.memory_space<vmem>>, vector<1x8xf32>
    %c0_7 = arith.constant 0 : index
    %c0_8 = arith.constant 0 : index
    %11 = vector.load %arg5[%c0_7, %c0_8] : memref<1x8xf32, #tpu.memory_space<vmem>>, vector<1x8xf32>
    %12 = arith.negf %11 : vector<1x8xf32>
    %13 = math.exp %12 : vector<1x8xf32>
    %cst_9 = arith.constant 1.000000e+00 : f32
    %14 = vector.broadcast %cst_9 : f32 to vector<1x8xf32>
    %15 = arith.addf %14, %13 : vector<1x8xf32>
    %16 = arith.divf %14, %15 : vector<1x8xf32>
    %17 = arith.mulf %10, %16 : vector<1x8xf32>
    %c0_10 = arith.constant 0 : index
    %c0_11 = arith.constant 0 : index
    %18 = vector.load %arg6[%c0_10, %c0_11] : memref<1x8xf32, #tpu.memory_space<vmem>>, vector<1x8xf32>
    %19 = arith.addf %17, %18 : vector<1x8xf32>
    %20 = arith.truncf %9 : vector<36x8xf32> to vector<36x8xbf16>
    %c0_12 = arith.constant 0 : index
    %c0_13 = arith.constant 0 : index
    %21 = vector.load %arg7[%c0_12, %c0_13] : memref<36x8xbf16, #tpu.memory_space<vmem>>, vector<36x8xbf16>
    tpu.vector_store %arg7[%c0_12, %c0_13], %20 {strides = array<i32>} : memref<36x8xbf16, #tpu.memory_space<vmem>>, vector<36x8xbf16>,
    %c0_14 = arith.constant 0 : index
    %c0_15 = arith.constant 0 : index
    %22 = vector.load %arg8[%c0_14, %c0_15] : memref<1x8xf32, #tpu.memory_space<vmem>>, vector<1x8xf32>
    tpu.vector_store %arg8[%c0_14, %c0_15], %19 {strides = array<i32>} : memref<1x8xf32, #tpu.memory_space<vmem>>, vector<1x8xf32>,
    return
  }
  func.func @transform_0(%arg0: i32) -> (i32, i32) {
    %c0_i32 = arith.constant 0 : i32
    %c0_i32_0 = arith.constant 0 : i32
    %c0_i32_1 = arith.constant 0 : i32
    return %c0_i32, %c0_i32_0 : i32, i32
  }
  func.func @transform_1(%arg0: i32) -> (i32, i32) {
    %c0_i32 = arith.constant 0 : i32
    %c0_i32_0 = arith.constant 0 : i32
    %c0_i32_1 = arith.constant 0 : i32
    return %c0_i32, %c0_i32_0 : i32, i32
  }
  func.func @transform_2(%arg0: i32) -> (i32, i32) {
    %c0_i32 = arith.constant 0 : i32
    %c0_i32_0 = arith.constant 0 : i32
    %c0_i32_1 = arith.constant 0 : i32
    return %c0_i32, %c0_i32_0 : i32, i32
  }
  func.func @transform_3(%arg0: i32) -> (i32, i32) {
    %c0_i32 = arith.constant 0 : i32
    %c0_i32_0 = arith.constant 0 : i32
    %c0_i32_1 = arith.constant 0 : i32
    return %c0_i32, %c0_i32_0 : i32, i32
  }
  func.func @transform_4(%arg0: i32) -> (i32, i32) {
    %c0_i32 = arith.constant 0 : i32
    %c0_i32_0 = arith.constant 0 : i32
    %c0_i32_1 = arith.constant 0 : i32
    return %c0_i32, %c0_i32_0 : i32, i32
  }
  func.func @transform_5(%arg0: i32) -> (i32, i32) {
    %c0_i32 = arith.constant 0 : i32
    %c0_i32_0 = arith.constant 0 : i32
    %c0_i32_1 = arith.constant 0 : i32
    return %c0_i32, %c0_i32_0 : i32, i32
  }
  func.func @transform_6(%arg0: i32) -> (i32, i32) {
    %c0_i32 = arith.constant 0 : i32
    %c0_i32_0 = arith.constant 0 : i32
    %c0_i32_1 = arith.constant 0 : i32
    return %c0_i32, %c0_i32_0 : i32, i32
  }
  func.func @transform_7(%arg0: i32) -> (i32, i32) {
    %c0_i32 = arith.constant 0 : i32
    %c0_i32_0 = arith.constant 0 : i32
    %c0_i32_1 = arith.constant 0 : i32
    return %c0_i32, %c0_i32_0 : i32, i32
  }
}

</mosaic_0001>

<bundles_post_ra>
// kernel: tpu_custom_call.1
= control target key start
LH: loop header
LB: loop body
LE: loop exit
PB: predicated region body
PF: predicated region fallthrough
CT: control target
= control target key end

     0   :  { %s320_s0 = inlined_call_operand.vmem [shape: f32[36,8], index: 0, kind: input, shape index: {}]   ;;  %s321_s1 = inlined_call_operand.vmem [shape: f32[36,8], index: 1, kind: input, shape index: {}]   ;;  %s322_s2 = inlined_call_operand.vmem [shape: f32[36,8], index: 2, kind: input, shape index: {}]   ;;  %s323_s3 = inlined_call_operand.vmem [shape: f32[1,8], index: 3, kind: input, shape index: {}]   ;;  %s324_s4 = inlined_call_operand.vmem [shape: f32[1,8], index: 4, kind: input, shape index: {}]   ;;  %s325_s5 = inlined_call_operand.vmem [shape: f32[1,8], index: 5, kind: input, shape index: {}]   ;;  %s326_s6 = inlined_call_operand.vmem [shape: bf16[36,8], index: 6, kind: output, shape index: {0}]   ;;  %s327_s7 = inlined_call_operand.hbm [shape: f32[1,8], index: 7, kind: output, shape index: {1}]  }
   0x1   :  { %v82_v0 = vld [vmem:[%s324_s4] sm:$0x1]  ;;  %v32_v4 = vld [vmem:[%s321_s1 + $0x8] sm:$0xff]  ;;  %v33_v6 = vld [vmem:[%s321_s1 + $0x10] sm:$0xff] }
   0x2   :  { %v145_v1 = vmul.f32 -1.442695, %v82_v0  ;;  %v31_v2 = vld [vmem:[%s321_s1] sm:$0xff]  ;;  %v141_v5 = vmul.f32 -1.442695, %v32_v4  ;;  %v34_v8 = vld [vmem:[%s321_s1 + $0x18] sm:$0xff] }
   0x3   :  { %v140_v3 = vmul.f32 -1.442695, %v31_v2  ;;  %v142_v7 = vmul.f32 -1.442695, %v33_v6  ;;  %v143_v9 = vmul.f32 -1.442695, %v34_v8 }
   0x4   :  { %157 = vpow2.f32 %v145_v1  ;;  %v35_v10 = vld [vmem:[%s321_s1 + $0x20] sm:$0xf] }
   0x5   :  { %159 = vpow2.f32 %v140_v3  ;;  %v144_v11 = vmul.f32 -1.442695, %v35_v10 }
   0x6   :  { %161 = vpow2.f32 %v141_v5 }
   0x7   :  { %163 = vpow2.f32 %v142_v7 }
   0x8   :  { %13 = vsyncpa [#allocation3], 0  ;;  %165 = vpow2.f32 %v143_v9  ;;  %v81_v24 = vld [vmem:[%s323_s3] sm:$0x1]  ;;  %v27_v28 = vld [vmem:[%s320_s0 + $0x8] sm:$0xff]  ;;  %s203_s19 = smov [#allocation2]  }
   0x9   :  { %167 = vpow2.f32 %v144_v11  ;;  %v26_v25 = vld [vmem:[%s320_s0] sm:$0xff]  ;;  %s130_s20 = sshll.u32 %s203_s19, 4  ;;  %v28_v32 = vld [vmem:[%s320_s0 + $0x10] sm:$0xff]  ;;  %vm120_vm0 = vcmask 57344   ;;  %v72_v35 = vld [vmem:[%s322_s2 + $0x8] sm:$0xff]  ;;  %vm113_vm1 = vcmask 60416   ;;  %s131_s20 = int_to_ptr.vmem [resolvable:$true] %s130_s20 }
   0xa   :  { %v90_v27 = vld [vmem:[%s325_s5] sm:$0x1]  ;;  %v29_v36 = vld [vmem:[%s320_s0 + $0x18] sm:$0xff]  ;;  %v73_v40 = vld [vmem:[%s322_s2 + $0x10] sm:$0xff]  ;;  %s185_s11 = scalar_lea.vmem %s131_s20, 32  ;;  %p186_p1 = scmp.lt.s32.totalorder %s131_s20, %s131_s20 }
   0xb   :  { %v71_v31 = vld [vmem:[%s322_s2] sm:$0xff]  ;;  %v74_v45 = vld [vmem:[%s322_s2 + $0x18] sm:$0xff] }
   0xc   :  { %v30_v41 = vld [vmem:[%s320_s0 + $0x20] sm:$0xf]  ;;  %s181_s0 = scalar_lea.vmem %s131_s20, 16 }
   0xd   :  { %v75_v49 = vld [vmem:[%s322_s2 + $0x20] sm:$0xf]  ;;  %p182_p0 = scmp.ne.s32.totalorder %s131_s20, %s181_s0  ;;  %p187_p2 = scmp.lt.s32.totalorder %s185_s11, %s181_s0 }
   0xf   :  { %p188_p3 = por %p187_p2, %p186_p1 }
  0x11   :  { %v158_v12 = vpop.eup %157  ;;  %p189_p4 = pnand %p188_p3, %p182_p0 }
  0x12   :  { %v160_v13 = vpop.eup %159  ;;  %v86_v14 = vadd.f32 1.0, %v158_v12 }
  0x13   :  { %v162_v15 = vpop.eup %161  ;;  %v51_v16 = vadd.f32 1.0, %v160_v13 }
  0x14   :  { %v164_v17 = vpop.eup %163  ;;  %169 = vrcp.f32 %v86_v14  ;;  %v52_v18 = vadd.f32 1.0, %v162_v15 }
  0x15   :  { %v166_v19 = vpop.eup %165  ;;  %171 = vrcp.f32 %v51_v16  ;;  %v53_v20 = vadd.f32 1.0, %v164_v17 }
  0x16   :  { %v168_v21 = vpop.eup %167  ;;  %173 = vrcp.f32 %v52_v18  ;;  %v54_v22 = vadd.f32 1.0, %v166_v19 }
  0x17   :  { %175 = vrcp.f32 %v53_v20  ;;  %v55_v23 = vadd.f32 1.0, %v168_v21 }
  0x18   :  { %177 = vrcp.f32 %v54_v22 }
  0x19   :  { %179 = vrcp.f32 %v55_v23 }
  0x21   :  { %v170_v26 = vpop.eup %169 }
  0x22   :  { %v172_v29 = vpop.eup %171  ;;  %v89_v30 = vmul.f32 %v170_v26, %v81_v24 }
  0x23   :  { %v174_v33 = vpop.eup %173  ;;  %v66_v34 = vmul.f32 %v172_v29, %v26_v25 }
  0x24   :  { %v176_v37 = vpop.eup %175  ;;  %v91_v38 = vadd.f32 %v90_v27, %v89_v30  ;;  %v67_v39 = vmul.f32 %v174_v33, %v27_v28 }
  0x25   :  { %v178_v42 = vpop.eup %177  ;;  %v76_v43 = vadd.f32 %v71_v31, %v66_v34  ;;  %v68_v44 = vmul.f32 %v176_v37, %v28_v32 }
  0x26   :  { %v180_v46 = vpop.eup %179  ;;  %121 = vst.msk [vmem:[#allocation2] sm:$0x1] %vm120_vm0, %v91_v38  ;;  %v77_v47 = vadd.f32 %v72_v35, %v67_v39  ;;  %v69_v48 = vmul.f32 %v178_v42, %v29_v36 }
  0x27   :  { %v151_v50 = vpack.c.bf16 %v76_v43, %v76_v43  ;;  %v78_v51 = vadd.f32 %v73_v40, %v68_v44  ;;  %v70_v52 = vmul.f32 %v180_v46, %v30_v41 }
  0x28   :  { %192 = shalt.err (!%p189_p4)
}
  0x29   :  { %133 = dma.vmem_to_hbm [thread:$0]  %s131_s20, 16, %s327_s7, [#allocation3]   ;;  %v152_v53 = vpack.c.bf16 %v77_v47, %v77_v47  ;;  %v79_v54 = vadd.f32 %v74_v45, %v69_v48  ;;  %114 = vst.msk [vmem:[%s326_s6] sm:$0xf] %vm113_vm1, %v151_v50  ;;  %v153_v55 = vpack.c.bf16 %v78_v51, %v78_v51  ;;  %v80_v56 = vadd.f32 %v75_v49, %v70_v52 }
  0x2a   :  { %vm118_vm2 = vcmask 58368  }
  0x2b   :  { %115 = vst.msk [vmem:[%s326_s6 + $0x4] sm:$0xf] %vm113_vm1, %v152_v53  ;;  %v154_v57 = vpack.c.bf16 %v79_v54, %v79_v54  ;;  %116 = vst.msk [vmem:[%s326_s6 + $0x8] sm:$0xf] %vm113_vm1, %v153_v55  ;;  %v155_v58 = vpack.c.bf16 %v80_v56, %v80_v56 }
  0x2d   :  { %117 = vst.msk [vmem:[%s326_s6 + $0xc] sm:$0xf] %vm113_vm1, %v154_v57 }
  0x2e   :  { %119 = vst.msk [vmem:[%s326_s6 + $0x10] sm:$0x3] %vm118_vm2, %v155_v58 }
  0x2f   :  { %201 = dma.done.wait [#allocation3], 16  }
  0x30   :  { %202 = vsyncadd [#allocation3], 4294967280 }
  0x31   :  { %139 = vsyncpa [#allocation3], 1 }

</bundles_post_ra>
